<compile_context>
chip_gen: v5e
topology: v5e:2x2
jax: 0.10.0
libtpu: 0.0.40
codegen_flags: <defaults>
</compile_context>

<pallas_src>
import jax
import jax.numpy as jnp
from jax import lax
from jax.experimental import pallas as pl
from jax.experimental.pallas import tpu as pltpu


def _convT_to_band(w, W):
    """ConvTranspose2d weight (Cin, Cout, 3, 3) -> (3, W*C, W*C) banded matrices.

    Equivalent regular-conv taps: K[kh, kw, ci, co] = w[ci, co, 2-kh, 2-kw].
    band[kh, w_in*C+ci, w_out*C+co] = K[kh, w_in-w_out+1, ci, co] (0 otherwise),
    i.e. the band encodes both the kw shifts and the w-edge zero padding, so a
    single (rows, W*C) @ (W*C, W*C) matmul applies one kh tap over all w, c.
    """
    C = w.shape[0]
    K = jnp.transpose(w[:, :, ::-1, ::-1].astype(jnp.float32), (2, 3, 0, 1))  # (3,3,C,C)
    wi = jnp.arange(W)[:, None]
    wo = jnp.arange(W)[None, :]
    # S[kw, w_in, w_out] = 1 iff w_in == w_out + kw - 1
    S = jnp.stack([(wi - wo == kw - 1).astype(jnp.float32) for kw in range(3)], 0)
    band = jnp.einsum('kxy,hkio->hxiyo', S, K)  # (3, W, C, W, C)
    return band.reshape(3, W * C, W * C)


def _row_shift_matrices(N, H):
    """(2, N*H, N*H) matrices moving rows by h-1 / h+1 with zero-pad + batch isolation."""
    NH = N * H
    r = jnp.arange(NH)
    h = r % H
    mats = []
    for s in (-1, 1):                       # kh = 0 and kh = 2 taps (kh = 1 is identity)
        valid = (h + s >= 0) & (h + s <= H - 1)
        m = (r[None, :] == r[:, None] + s) & valid[:, None]
        mats.append(m.astype(jnp.float32))
    return jnp.stack(mats, 0)


def _make_kernel(N, H, W, C, eps=1e-5):
    NH, WC = N * H, W * C

    def kernel(x_ref, shift_ref, band1_ref, band2_ref, pool_ref,
               g1_ref, b1_ref, g2_ref, b2_ref, o_ref):
        x = x_ref[...]            # (NH, WC) lane-dense activations
        pool = pool_ref[...]      # (WC, WC) per-channel pooling (pre-scaled by 1/count)

        def conv(v, band_ref):
            # 3x3 "conv" (== the ConvTranspose) as 5 lane-dense MXU matmuls:
            # two row shifts (kh taps) and three banded channel/kw contractions.
            acc = jnp.dot(v, band_ref[1], preferred_element_type=jnp.float32)
            up = jnp.dot(shift_ref[0], v, preferred_element_type=jnp.float32)   # x[n, h-1]
            acc = acc + jnp.dot(up, band_ref[0], preferred_element_type=jnp.float32)
            dn = jnp.dot(shift_ref[1], v, preferred_element_type=jnp.float32)   # x[n, h+1]
            acc = acc + jnp.dot(dn, band_ref[2], preferred_element_type=jnp.float32)
            return acc

        def batchnorm(y, g_ref, b_ref):
            # Training-mode BN: per-channel stats over (N, H, W) == over all rows
            # and over the W channel-groups of the lane axis.  Fused sum / sum-sq
            # sublane reduce; a tiny matmul pools per-channel and re-tiles the
            # (already 1/count-scaled) means across the lane axis.
            s1 = jnp.sum(y, axis=0, keepdims=True)
            s2 = jnp.sum(y * y, axis=0, keepdims=True)
            mean = jnp.dot(s1, pool, preferred_element_type=jnp.float32)
            ex2 = jnp.dot(s2, pool, preferred_element_type=jnp.float32)
            var = ex2 - mean * mean                      # biased variance
            return (y - mean) * lax.rsqrt(var + eps) * g_ref[...] + b_ref[...]

        out = conv(x, band1_ref)
        out = jnp.maximum(batchnorm(out, g1_ref, b1_ref), 0.0)   # bn1 + relu
        out = conv(out, band2_ref)
        out = batchnorm(out, g2_ref, b2_ref)                     # bn2
        o_ref[...] = jnp.maximum(out + x, 0.0)                   # residual + relu

    return kernel


def basic_block_forward(x_nchw, w1, w2, g1, b1, g2, b2):
    N, C, H, W = x_nchw.shape
    NH, WC = N * H, W * C

    # Lane-dense kernel layout: rows = (n, h), lanes = (w, c).
    x_rows = jnp.transpose(x_nchw, (0, 2, 3, 1)).reshape(NH, WC).astype(jnp.float32)

    band1 = _convT_to_band(w1, W)                         # (3, WC, WC)
    band2 = _convT_to_band(w2, W)
    shift = _row_shift_matrices(N, H)                     # (2, NH, NH)
    pool = jnp.tile(jnp.eye(C, dtype=jnp.float32), (W, W)) / float(N * H * W)  # (WC, WC)

    def tile_param(p):                                    # per-channel -> per-lane
        return jnp.tile(p.astype(jnp.float32), W).reshape(1, WC)

    kernel = _make_kernel(N, H, W, C)
    vmem = pl.BlockSpec(memory_space=pltpu.MemorySpace.VMEM)
    out = pl.pallas_call(
        kernel,
        out_shape=jax.ShapeDtypeStruct((NH, WC), jnp.float32),
        in_specs=[vmem] * 9,
        out_specs=vmem,
    )(x_rows, shift, band1, band2, pool,
      tile_param(g1), tile_param(b1), tile_param(g2), tile_param(b2))

    return jnp.transpose(out.reshape(N, H, W, C), (0, 3, 1, 2))   # -> NCHW


def reference_forward(x, w1, w2, g1, b1, g2, b2, eps=1e-5):
    """Pure-JAX reference (definitional ConvTranspose, two-pass BN) for verification."""
    N, C, H, W = x.shape

    def convT(inp, w):
        # y[n,co,i,j] = sum_{ci,a,b} inp[n,ci,i-a+1,j-b+1] * w[ci,co,a,b]
        xp = jnp.pad(inp, ((0, 0), (0, 0), (1, 1), (1, 1)))
        y = jnp.zeros((N, w.shape[1], H, W), jnp.float32)
        for a in range(3):
            for b in range(3):
                patch = xp[:, :, 2 - a:2 - a + H, 2 - b:2 - b + W]
                y = y + jnp.einsum('ncij,cd->ndij', patch, w[:, :, a, b].astype(jnp.float32))
        return y

    def bn(y, g, b):
        mean = y.mean(axis=(0, 2, 3), keepdims=True)
        var = ((y - mean) ** 2).mean(axis=(0, 2, 3), keepdims=True)
        return ((y - mean) * lax.rsqrt(var + eps) * g.reshape(1, -1, 1, 1)
                + b.reshape(1, -1, 1, 1))

    out = jax.nn.relu(bn(convT(x, w1), g1, b1))
    out = bn(convT(out, w2), g2, b2)
    return jax.nn.relu(out + x)


if __name__ == "__main__":
    planes = 4
    N, H, W = 2, 16, 16

    key = jax.random.PRNGKey(0)
    k1, k2, k3, k4, k5, k6, k7 = jax.random.split(key, 7)

    bound = 1.0 / (planes * 9) ** 0.5  # kaiming-uniform-ish, like PyTorch conv init
    w1 = jax.random.uniform(k1, (planes, planes, 3, 3), jnp.float32, -bound, bound)
    w2 = jax.random.uniform(k2, (planes, planes, 3, 3), jnp.float32, -bound, bound)
    g1 = 1.0 + 0.1 * jax.random.normal(k3, (planes,), jnp.float32)
    b1 = 0.1 * jax.random.normal(k4, (planes,), jnp.float32)
    g2 = 1.0 + 0.1 * jax.random.normal(k5, (planes,), jnp.float32)
    b2 = 0.1 * jax.random.normal(k6, (planes,), jnp.float32)

    x = jax.random.normal(k7, (N, planes, H, W), jnp.float32)

    out = jax.block_until_ready(basic_block_forward(x, w1, w2, g1, b1, g2, b2))
    ref = reference_forward(x, w1, w2, g1, b1, g2, b2)

    assert out.shape == x.shape, (out.shape, x.shape)
    max_err = float(jnp.max(jnp.abs(out - ref)))
    assert jnp.allclose(out, ref, rtol=1e-4, atol=1e-4), f"max_err={max_err}"
    print("KERNEL_OK")
</pallas_src>

<mosaic_0001>
module attributes {stable_mosaic.version = 11 : i64} {
  func.func @kernel(%arg0: memref<32x64xf32, #tpu.memory_space<vmem>>, %arg1: memref<2x32x32xf32, #tpu.memory_space<vmem>>, %arg2: memref<3x64x64xf32, #tpu.memory_space<vmem>>, %arg3: memref<3x64x64xf32, #tpu.memory_space<vmem>>, %arg4: memref<64x64xf32, #tpu.memory_space<vmem>>, %arg5: memref<1x64xf32, #tpu.memory_space<vmem>>, %arg6: memref<1x64xf32, #tpu.memory_space<vmem>>, %arg7: memref<1x64xf32, #tpu.memory_space<vmem>>, %arg8: memref<1x64xf32, #tpu.memory_space<vmem>>, %arg9: memref<32x64xf32, #tpu.memory_space<vmem>>) attributes {dimension_semantics = [], scalar_prefetch = 0 : i64, scratch_operands = 0 : i64, tpu.core_type = #tpu.core_type<tc>} {
    %c0 = arith.constant 0 : index
    %c0_0 = arith.constant 0 : index
    %0 = vector.load %arg0[%c0, %c0_0] : memref<32x64xf32, #tpu.memory_space<vmem>>, vector<32x64xf32>
    %c0_1 = arith.constant 0 : index
    %c0_2 = arith.constant 0 : index
    %1 = vector.load %arg4[%c0_1, %c0_2] : memref<64x64xf32, #tpu.memory_space<vmem>>, vector<64x64xf32>
    %c1 = arith.constant 1 : index
    %c0_3 = arith.constant 0 : index
    %c0_4 = arith.constant 0 : index
    %2 = vector.load %arg2[%c1, %c0_3, %c0_4] : memref<3x64x64xf32, #tpu.memory_space<vmem>>, vector<1x64x64xf32>
    %3 = vector.shape_cast %2 : vector<1x64x64xf32> to vector<64x64xf32>
    %cst = arith.constant dense<0.000000e+00> : vector<32x64xf32>
    %4 = tpu.matmul %0, %3, %cst {dimension_numbers = #tpu.dot_dimension_numbers<[1], [0], [0], [1], [0, 0, 1, 1], [], []>} : vector<32x64xf32>, vector<64x64xf32>, vector<32x64xf32> -> vector<32x64xf32>
    %c0_5 = arith.constant 0 : index
    %c0_6 = arith.constant 0 : index
    %c0_7 = arith.constant 0 : index
    %5 = vector.load %arg1[%c0_5, %c0_6, %c0_7] : memref<2x32x32xf32, #tpu.memory_space<vmem>>, vector<1x32x32xf32>
    %6 = vector.shape_cast %5 : vector<1x32x32xf32> to vector<32x32xf32>
    %cst_8 = arith.constant dense<0.000000e+00> : vector<32x64xf32>
    %7 = tpu.matmul %6, %0, %cst_8 {dimension_numbers = #tpu.dot_dimension_numbers<[1], [0], [0], [1], [0, 0, 1, 1], [], []>} : vector<32x32xf32>, vector<32x64xf32>, vector<32x64xf32> -> vector<32x64xf32>
    %c0_9 = arith.constant 0 : index
    %c0_10 = arith.constant 0 : index
    %c0_11 = arith.constant 0 : index
    %8 = vector.load %arg2[%c0_9, %c0_10, %c0_11] : memref<3x64x64xf32, #tpu.memory_space<vmem>>, vector<1x64x64xf32>
    %9 = vector.shape_cast %8 : vector<1x64x64xf32> to vector<64x64xf32>
    %cst_12 = arith.constant dense<0.000000e+00> : vector<32x64xf32>
    %10 = tpu.matmul %7, %9, %cst_12 {dimension_numbers = #tpu.dot_dimension_numbers<[1], [0], [0], [1], [0, 0, 1, 1], [], []>} : vector<32x64xf32>, vector<64x64xf32>, vector<32x64xf32> -> vector<32x64xf32>
    %11 = arith.addf %4, %10 : vector<32x64xf32>
    %c1_13 = arith.constant 1 : index
    %c0_14 = arith.constant 0 : index
    %c0_15 = arith.constant 0 : index
    %12 = vector.load %arg1[%c1_13, %c0_14, %c0_15] : memref<2x32x32xf32, #tpu.memory_space<vmem>>, vector<1x32x32xf32>
    %13 = vector.shape_cast %12 : vector<1x32x32xf32> to vector<32x32xf32>
    %cst_16 = arith.constant dense<0.000000e+00> : vector<32x64xf32>
    %14 = tpu.matmul %13, %0, %cst_16 {dimension_numbers = #tpu.dot_dimension_numbers<[1], [0], [0], [1], [0, 0, 1, 1], [], []>} : vector<32x32xf32>, vector<32x64xf32>, vector<32x64xf32> -> vector<32x64xf32>
    %c2 = arith.constant 2 : index
    %c0_17 = arith.constant 0 : index
    %c0_18 = arith.constant 0 : index
    %15 = vector.load %arg2[%c2, %c0_17, %c0_18] : memref<3x64x64xf32, #tpu.memory_space<vmem>>, vector<1x64x64xf32>
    %16 = vector.shape_cast %15 : vector<1x64x64xf32> to vector<64x64xf32>
    %cst_19 = arith.constant dense<0.000000e+00> : vector<32x64xf32>
    %17 = tpu.matmul %14, %16, %cst_19 {dimension_numbers = #tpu.dot_dimension_numbers<[1], [0], [0], [1], [0, 0, 1, 1], [], []>} : vector<32x64xf32>, vector<64x64xf32>, vector<32x64xf32> -> vector<32x64xf32>
    %18 = arith.addf %11, %17 : vector<32x64xf32>
    %cst_20 = arith.constant dense<0.000000e+00> : vector<64xf32>
    %19 = vector.multi_reduction <add>, %18, %cst_20 [0] : vector<32x64xf32> to vector<64xf32>
    %20 = vector.shape_cast %19 : vector<64xf32> to vector<1x64xf32>
    %21 = arith.mulf %18, %18 : vector<32x64xf32>
    %cst_21 = arith.constant dense<0.000000e+00> : vector<64xf32>
    %22 = vector.multi_reduction <add>, %21, %cst_21 [0] : vector<32x64xf32> to vector<64xf32>
    %23 = vector.shape_cast %22 : vector<64xf32> to vector<1x64xf32>
    %cst_22 = arith.constant dense<0.000000e+00> : vector<1x64xf32>
    %24 = tpu.matmul %20, %1, %cst_22 {dimension_numbers = #tpu.dot_dimension_numbers<[1], [0], [0], [1], [0, 0, 1, 1], [], []>} : vector<1x64xf32>, vector<64x64xf32>, vector<1x64xf32> -> vector<1x64xf32>
    %cst_23 = arith.constant dense<0.000000e+00> : vector<1x64xf32>
    %25 = tpu.matmul %23, %1, %cst_23 {dimension_numbers = #tpu.dot_dimension_numbers<[1], [0], [0], [1], [0, 0, 1, 1], [], []>} : vector<1x64xf32>, vector<64x64xf32>, vector<1x64xf32> -> vector<1x64xf32>
    %26 = arith.mulf %24, %24 : vector<1x64xf32>
    %27 = arith.subf %25, %26 : vector<1x64xf32>
    %28 = vector.broadcast %24 : vector<1x64xf32> to vector<32x64xf32>
    %29 = arith.subf %18, %28 : vector<32x64xf32>
    %cst_24 = arith.constant 9.99999974E-6 : f32
    %30 = vector.broadcast %cst_24 : f32 to vector<1x64xf32>
    %31 = arith.addf %27, %30 : vector<1x64xf32>
    %32 = math.rsqrt %31 : vector<1x64xf32>
    %33 = vector.broadcast %32 : vector<1x64xf32> to vector<32x64xf32>
    %34 = arith.mulf %29, %33 : vector<32x64xf32>
    %c0_25 = arith.constant 0 : index
    %c0_26 = arith.constant 0 : index
    %35 = vector.load %arg5[%c0_25, %c0_26] : memref<1x64xf32, #tpu.memory_space<vmem>>, vector<1x64xf32>
    %36 = vector.broadcast %35 : vector<1x64xf32> to vector<32x64xf32>
    %37 = arith.mulf %34, %36 : vector<32x64xf32>
    %c0_27 = arith.constant 0 : index
    %c0_28 = arith.constant 0 : index
    %38 = vector.load %arg6[%c0_27, %c0_28] : memref<1x64xf32, #tpu.memory_space<vmem>>, vector<1x64xf32>
    %39 = vector.broadcast %38 : vector<1x64xf32> to vector<32x64xf32>
    %40 = arith.addf %37, %39 : vector<32x64xf32>
    %cst_29 = arith.constant 0.000000e+00 : f32
    %41 = vector.broadcast %cst_29 : f32 to vector<32x64xf32>
    %42 = arith.maximumf %40, %41 : vector<32x64xf32>
    %c1_30 = arith.constant 1 : index
    %c0_31 = arith.constant 0 : index
    %c0_32 = arith.constant 0 : index
    %43 = vector.load %arg3[%c1_30, %c0_31, %c0_32] : memref<3x64x64xf32, #tpu.memory_space<vmem>>, vector<1x64x64xf32>
    %44 = vector.shape_cast %43 : vector<1x64x64xf32> to vector<64x64xf32>
    %cst_33 = arith.constant dense<0.000000e+00> : vector<32x64xf32>
    %45 = tpu.matmul %42, %44, %cst_33 {dimension_numbers = #tpu.dot_dimension_numbers<[1], [0], [0], [1], [0, 0, 1, 1], [], []>} : vector<32x64xf32>, vector<64x64xf32>, vector<32x64xf32> -> vector<32x64xf32>
    %c0_34 = arith.constant 0 : index
    %c0_35 = arith.constant 0 : index
    %c0_36 = arith.constant 0 : index
    %46 = vector.load %arg1[%c0_34, %c0_35, %c0_36] : memref<2x32x32xf32, #tpu.memory_space<vmem>>, vector<1x32x32xf32>
    %47 = vector.shape_cast %46 : vector<1x32x32xf32> to vector<32x32xf32>
    %cst_37 = arith.constant dense<0.000000e+00> : vector<32x64xf32>
    %48 = tpu.matmul %47, %42, %cst_37 {dimension_numbers = #tpu.dot_dimension_numbers<[1], [0], [0], [1], [0, 0, 1, 1], [], []>} : vector<32x32xf32>, vector<32x64xf32>, vector<32x64xf32> -> vector<32x64xf32>
    %c0_38 = arith.constant 0 : index
    %c0_39 = arith.constant 0 : index
    %c0_40 = arith.constant 0 : index
    %49 = vector.load %arg3[%c0_38, %c0_39, %c0_40] : memref<3x64x64xf32, #tpu.memory_space<vmem>>, vector<1x64x64xf32>
    %50 = vector.shape_cast %49 : vector<1x64x64xf32> to vector<64x64xf32>
    %cst_41 = arith.constant dense<0.000000e+00> : vector<32x64xf32>
    %51 = tpu.matmul %48, %50, %cst_41 {dimension_numbers = #tpu.dot_dimension_numbers<[1], [0], [0], [1], [0, 0, 1, 1], [], []>} : vector<32x64xf32>, vector<64x64xf32>, vector<32x64xf32> -> vector<32x64xf32>
    %52 = arith.addf %45, %51 : vector<32x64xf32>
    %c1_42 = arith.constant 1 : index
    %c0_43 = arith.constant 0 : index
    %c0_44 = arith.constant 0 : index
    %53 = vector.load %arg1[%c1_42, %c0_43, %c0_44] : memref<2x32x32xf32, #tpu.memory_space<vmem>>, vector<1x32x32xf32>
    %54 = vector.shape_cast %53 : vector<1x32x32xf32> to vector<32x32xf32>
    %cst_45 = arith.constant dense<0.000000e+00> : vector<32x64xf32>
    %55 = tpu.matmul %54, %42, %cst_45 {dimension_numbers = #tpu.dot_dimension_numbers<[1], [0], [0], [1], [0, 0, 1, 1], [], []>} : vector<32x32xf32>, vector<32x64xf32>, vector<32x64xf32> -> vector<32x64xf32>
    %c2_46 = arith.constant 2 : index
    %c0_47 = arith.constant 0 : index
    %c0_48 = arith.constant 0 : index
    %56 = vector.load %arg3[%c2_46, %c0_47, %c0_48] : memref<3x64x64xf32, #tpu.memory_space<vmem>>, vector<1x64x64xf32>
    %57 = vector.shape_cast %56 : vector<1x64x64xf32> to vector<64x64xf32>
    %cst_49 = arith.constant dense<0.000000e+00> : vector<32x64xf32>
    %58 = tpu.matmul %55, %57, %cst_49 {dimension_numbers = #tpu.dot_dimension_numbers<[1], [0], [0], [1], [0, 0, 1, 1], [], []>} : vector<32x64xf32>, vector<64x64xf32>, vector<32x64xf32> -> vector<32x64xf32>
    %59 = arith.addf %52, %58 : vector<32x64xf32>
    %cst_50 = arith.constant dense<0.000000e+00> : vector<64xf32>
    %60 = vector.multi_reduction <add>, %59, %cst_50 [0] : vector<32x64xf32> to vector<64xf32>
    %61 = vector.shape_cast %60 : vector<64xf32> to vector<1x64xf32>
    %62 = arith.mulf %59, %59 : vector<32x64xf32>
    %cst_51 = arith.constant dense<0.000000e+00> : vector<64xf32>
    %63 = vector.multi_reduction <add>, %62, %cst_51 [0] : vector<32x64xf32> to vector<64xf32>
    %64 = vector.shape_cast %63 : vector<64xf32> to vector<1x64xf32>
    %cst_52 = arith.constant dense<0.000000e+00> : vector<1x64xf32>
    %65 = tpu.matmul %61, %1, %cst_52 {dimension_numbers = #tpu.dot_dimension_numbers<[1], [0], [0], [1], [0, 0, 1, 1], [], []>} : vector<1x64xf32>, vector<64x64xf32>, vector<1x64xf32> -> vector<1x64xf32>
    %cst_53 = arith.constant dense<0.000000e+00> : vector<1x64xf32>
    %66 = tpu.matmul %64, %1, %cst_53 {dimension_numbers = #tpu.dot_dimension_numbers<[1], [0], [0], [1], [0, 0, 1, 1], [], []>} : vector<1x64xf32>, vector<64x64xf32>, vector<1x64xf32> -> vector<1x64xf32>
    %67 = arith.mulf %65, %65 : vector<1x64xf32>
    %68 = arith.subf %66, %67 : vector<1x64xf32>
    %69 = vector.broadcast %65 : vector<1x64xf32> to vector<32x64xf32>
    %70 = arith.subf %59, %69 : vector<32x64xf32>
    %cst_54 = arith.constant 9.99999974E-6 : f32
    %71 = vector.broadcast %cst_54 : f32 to vector<1x64xf32>
    %72 = arith.addf %68, %71 : vector<1x64xf32>
    %73 = math.rsqrt %72 : vector<1x64xf32>
    %74 = vector.broadcast %73 : vector<1x64xf32> to vector<32x64xf32>
    %75 = arith.mulf %70, %74 : vector<32x64xf32>
    %c0_55 = arith.constant 0 : index
    %c0_56 = arith.constant 0 : index
    %76 = vector.load %arg7[%c0_55, %c0_56] : memref<1x64xf32, #tpu.memory_space<vmem>>, vector<1x64xf32>
    %77 = vector.broadcast %76 : vector<1x64xf32> to vector<32x64xf32>
    %78 = arith.mulf %75, %77 : vector<32x64xf32>
    %c0_57 = arith.constant 0 : index
    %c0_58 = arith.constant 0 : index
    %79 = vector.load %arg8[%c0_57, %c0_58] : memref<1x64xf32, #tpu.memory_space<vmem>>, vector<1x64xf32>
    %80 = vector.broadcast %79 : vector<1x64xf32> to vector<32x64xf32>
    %81 = arith.addf %78, %80 : vector<32x64xf32>
    %82 = arith.addf %81, %0 : vector<32x64xf32>
    %cst_59 = arith.constant 0.000000e+00 : f32
    %83 = vector.broadcast %cst_59 : f32 to vector<32x64xf32>
    %84 = arith.maximumf %82, %83 : vector<32x64xf32>
    %c0_60 = arith.constant 0 : index
    %c0_61 = arith.constant 0 : index
    %85 = vector.load %arg9[%c0_60, %c0_61] : memref<32x64xf32, #tpu.memory_space<vmem>>, vector<32x64xf32>
    tpu.vector_store %arg9[%c0_60, %c0_61], %84 {strides = array<i32>} : memref<32x64xf32, #tpu.memory_space<vmem>>, vector<32x64xf32>,
    return
  }
}

</mosaic_0001>

<bundles_post_ra>
// kernel: tpu_custom_call.1
= control target key start
LH: loop header
LB: loop body
LE: loop exit
PB: predicated region body
PF: predicated region fallthrough
CT: control target
= control target key end

     0   :  { %14 = vsyncpa [#allocation3], 0  ;;  %s1379_s0 = inlined_call_operand.hbm [shape: f32[32,64], index: 0, kind: input, shape index: {}]   ;;  %s1380_s1 = inlined_call_operand.hbm [shape: f32[2,32,32], index: 1, kind: input, shape index: {}]   ;;  %s1381_s2 = inlined_call_operand.hbm [shape: f32[3,64,64], index: 2, kind: input, shape index: {}]   ;;  %s1382_s3 = inlined_call_operand.hbm [shape: f32[3,64,64], index: 3, kind: input, shape index: {}]   ;;  %s1383_s4 = inlined_call_operand.hbm [shape: f32[64,64], index: 4, kind: input, shape index: {}]   ;;  %s1384_s5 = inlined_call_operand.vmem [shape: f32[1,64], index: 5, kind: input, shape index: {}]   ;;  %s1385_s6 = inlined_call_operand.vmem [shape: f32[1,64], index: 6, kind: input, shape index: {}]   ;;  %s1386_s7 = inlined_call_operand.vmem [shape: f32[1,64], index: 7, kind: input, shape index: {}]   ;;  %s1387_s8 = inlined_call_operand.vmem [shape: f32[1,64], index: 8, kind: input, shape index: {}]   ;;  %s1388_s9 = inlined_call_operand.hbm [shape: f32[32,64], index: 9, kind: output, shape index: {}]  }
   0x1   :  { %15 = vsyncpa [#allocation6], 0 }
   0x2   :  { %16 = vsyncpa [#allocation9], 0 }
   0x3   :  { %17 = vsyncpa [#allocation4], 0  ;;  %s35_s11 = sshll.u32 %s1380_s1, 4  ;;  %s1063_s12 = smov [#allocation5]   ;;  %s36_s11 = int_to_ptr.hbm [resolvable:$true] %s35_s11 }
   0x4   :  { %s37_s13 = sshll.u32 %s1063_s12, 4  ;;  %s61_s16 = sshll.u32 %s1382_s3, 4  ;;  %s38_s13 = int_to_ptr.vmem [resolvable:$true] %s37_s13  ;;  %s62_s16 = int_to_ptr.hbm [resolvable:$true] %s61_s16 }
   0x5   :  { %s1064_s17 = smov 128   ;;  %s1065_s18 = smov 8  }
   0x6   :  { %43 = dma.hbm_to_vmem [thread:$0]  %s36_s11, 1024, %s38_s13, [#allocation6], %s1064_s17, %s1064_s17, %s1065_s18  }
   0x7   :  { %s1066_s19 = smov [#allocation8]   ;;  %s22_s1 = sshll.u32 %s1379_s0, 4  ;;  %s23_s1 = int_to_ptr.hbm [resolvable:$true] %s22_s1 }
   0x8   :  { %s63_s20 = sshll.u32 %s1066_s19, 4  ;;  %s48_s24 = sshll.u32 %s1381_s2, 4  ;;  %s64_s20 = int_to_ptr.vmem [resolvable:$true] %s63_s20  ;;  %s49_s24 = int_to_ptr.hbm [resolvable:$true] %s48_s24 }
   0x9   :  { %69 = dma.hbm_to_vmem [thread:$0]  %s62_s16, 3072, %s64_s20, [#allocation9], %s1064_s17, %s1064_s17, %s1065_s18  }
   0xa   :  { %s1067_s25 = smov [#allocation2]   ;;  %s1068_s27 = smov [#allocation7]  }
   0xb   :  { %s24_s26 = sshll.u32 %s1067_s25, 4  ;;  %s50_s0 = sshll.u32 %s1068_s27, 4  ;;  %s25_s26 = int_to_ptr.vmem [resolvable:$true] %s24_s26  ;;  %s51_s0 = int_to_ptr.vmem [resolvable:$true] %s50_s0 }
   0xc   :  { %30 = dma.hbm_to_vmem [thread:$0]  %s23_s1, 512, %s25_s26, [#allocation3], %s1064_s17, %s1064_s17, %s1065_s18  }
   0xd   :  { %s74_s30 = sshll.u32 %s1383_s4, 4  ;;  %s1069_s2 = smov [#allocation10]   ;;  %s75_s30 = int_to_ptr.hbm [resolvable:$true] %s74_s30 }
   0xe   :  { %56 = dma.hbm_to_vmem [thread:$0]  %s49_s24, 3072, %s51_s0, [#allocation6], %s1064_s17, %s1064_s17, %s1065_s18  }
   0xf   :  { %s76_s10 = sshll.u32 %s1069_s2, 4  ;;  %s77_s10 = int_to_ptr.vmem [resolvable:$true] %s76_s10 }
  0x10   :  { %82 = dma.hbm_to_vmem [thread:$0]  %s75_s30, 1024, %s77_s10, [#allocation9], %s1064_s17, %s1064_s17, %s1065_s18  }
  0x11   :  { %1055 = dma.done.wait [#allocation3], 512  }
  0x12   :  { %1056 = vsyncadd [#allocation3], 4294966784 }
  0x13   :  { %1057 = dma.done.wait [#allocation6], 4096  }
  0x14   :  { %1058 = vsyncadd [#allocation6], 4294963200 }
  0x15   :  { %1059 = dma.done.wait [#allocation9], 4096  }
  0x16   :  { %1060 = vsyncadd [#allocation9], 4294963200  ;;  %v1151_v0 = vld [vmem:[#allocation2 + $0x18] sm:$0xff]  ;;  %v1153_v1 = vld [vmem:[#allocation2 + $0x10] sm:$0xff]  ;;  %vm136_vm0 = vcmask 261120   ;;  %vm186_vm1 = vcmask 523264  }
  0x17   :  { %298 = vmatpush.msra.mxu3 %v1151_v0  ;;  %161 = vmatpush.msra.mxu0 %v1151_v0  ;;  %v1157_v2 = vld [vmem:[#allocation2 + $0x8] sm:$0xff]  ;;  %v1161_v3 = vld [vmem:[#allocation2] sm:$0xff]  ;;  %v131_v4 = vld [vmem:[#allocation7 + $0x78] sm:$0xff]  ;;  %s832_s20 = sshll.u32 %s1388_s9, 4  ;;  %s833_s20 = int_to_ptr.hbm [resolvable:$true] %s832_s20 }
  0x18   :  { %v1164_v5 = vld [vmem:[#allocation5 + $0x20] sm:$0xff]  ;;  %v185_v7 = vld [vmem:[#allocation7 + $0x38] sm:$0xff]  ;;  %248 = vmatpush.msra.mxu2 %v131_v4  ;;  %v130_v8 = vld [vmem:[#allocation7 + $0x70] sm:$0xff] }
  0x19   :  { %299 = vmatpush.msra.mxu3 %v1153_v1  ;;  %162 = vmatpush.msra.mxu0 %v1153_v1  ;;  %v1167_v6 = vld [vmem:[#allocation5] sm:$0xff]  ;;  %v184_v9 = vld [vmem:[#allocation7 + $0x30] sm:$0xff]  ;;  %v323_v10 = vld [vmem:[#allocation7 + $0xb8] sm:$0xff] }
  0x1a   :  { %207 = vmatpush.msra.mxu1 %v185_v7  ;;  %v129_v11 = vld [vmem:[#allocation7 + $0x68] sm:$0xff]  ;;  %249 = vmatpush.msra.mxu2 %v130_v8  ;;  %v322_v13 = vld [vmem:[#allocation7 + $0xb0] sm:$0xff]  ;;  %v128_v14 = vld [vmem:[#allocation7 + $0x60] sm:$0xff] }
  0x1b   :  { %300 = vmatpush.msra.mxu3 %v1157_v2  ;;  %163 = vmatpush.msra.mxu0 %v1157_v2  ;;  %v183_v12 = vld [vmem:[#allocation7 + $0x28] sm:$0xff]  ;;  %v182_v15 = vld [vmem:[#allocation7 + $0x20] sm:$0xff]  ;;  %v127_v17 = vld [vmem:[#allocation7 + $0x58] sm:$0xff] }
  0x1c   :  { %208 = vmatpush.msra.mxu1 %v184_v9  ;;  %v321_v16 = vld [vmem:[#allocation7 + $0xa8] sm:$0xff]  ;;  %250 = vmatpush.msra.mxu2 %v129_v11  ;;  %v181_v18 = vld [vmem:[#allocation7 + $0x18] sm:$0xff]  ;;  %v126_v21 = vld [vmem:[#allocation7 + $0x50] sm:$0xff] }
  0x1d   :  { %301 = vmatpush.msra.mxu3 %v1161_v3  ;;  %164 = vmatpush.msra.mxu0 %v1161_v3  ;;  %v1175_v19 = vld [vmem:[#allocation5 + $0x28] sm:$0xff]  ;;  %v320_v22 = vld [vmem:[#allocation7 + $0xa0] sm:$0xff]  ;;  %v180_v23 = vld [vmem:[#allocation7 + $0x10] sm:$0xff] }
  0x1e   :  { %859 = vmatmul.msk.f32.vlgmr.msra.gmra.mxu3 %vm136_vm0, %v1164_v5  ;;  %847 = vmatmul.msk.f32.vlgmr.msra.gmra.mxu0 %vm136_vm0, %v1167_v6  ;;  %v1177_v20 = vld [vmem:[#allocation5 + $0x8] sm:$0xff]  ;;  %v319_v25 = vld [vmem:[#allocation7 + $0x98] sm:$0xff]  ;;  %v124_v27 = vld [vmem:[#allocation7 + $0x40] sm:$0xff] }
  0x1f   :  { %344 = vmatpush.msrb.mxu0 %v323_v10  ;;  %209 = vmatpush.msra.mxu1 %v183_v12  ;;  %v125_v24 = vld [vmem:[#allocation7 + $0x48] sm:$0xff]  ;;  %v318_v28 = vld [vmem:[#allocation7 + $0x90] sm:$0xff]  ;;  %v1193_v31 = vld [vmem:[#allocation5 + $0x38] sm:$0xff] }
  0x20   :  { %251 = vmatpush.msra.mxu2 %v128_v14  ;;  %v179_v26 = vld [vmem:[#allocation7 + $0x8] sm:$0xff]  ;;  %v1183_v29 = vld [vmem:[#allocation5 + $0x30] sm:$0xff]  ;;  %v1195_v32 = vld [vmem:[#allocation5 + $0x18] sm:$0xff] }
  0x21   :  { %345 = vmatpush.msrb.mxu0 %v322_v13  ;;  %210 = vmatpush.msra.mxu1 %v182_v15  ;;  %v1185_v30 = vld [vmem:[#allocation5 + $0x10] sm:$0xff]  ;;  %v178_v33 = vld [vmem:[#allocation7] sm:$0xff]  ;;  %v317_v34 = vld [vmem:[#allocation7 + $0x88] sm:$0xff] }
  0x22   :  { %252 = vmatpush.msra.mxu2 %v127_v17  ;;  %v316_v35 = vld [vmem:[#allocation7 + $0x80] sm:$0xff]  ;;  %v1215_v46 = vld [vmem:[#allocation10 + $0x38] sm:$0xff]  ;;  %v1219_v47 = vld [vmem:[#allocation10 + $0x30] sm:$0xff] }
  0x23   :  { %346 = vmatpush.msrb.mxu0 %v321_v16  ;;  %211 = vmatpush.msra.mxu1 %v181_v18  ;;  %v1223_v49 = vld [vmem:[#allocation10 + $0x28] sm:$0xff]  ;;  %v1227_v51 = vld [vmem:[#allocation10 + $0x20] sm:$0xff]  ;;  %v1231_v53 = vld [vmem:[#allocation10 + $0x18] sm:$0xff] }
  0x24   :  { %253 = vmatpush.msra.mxu2 %v126_v21  ;;  %410 = vmatpush.msrb.mxu3 %v1215_v46  ;;  %v1233_v54 = vld [vmem:[#allocation10 + $0x10] sm:$0xff]  ;;  %v1237_v55 = vld [vmem:[#allocation10 + $0x8] sm:$0xff]  ;;  %v1241_v56 = vld [vmem:[#allocation10] sm:$0xff] }
  0x25   :  { %347 = vmatpush.msrb.mxu0 %v320_v22  ;;  %212 = vmatpush.msra.mxu1 %v180_v23 }
  0x26   :  { %860 = vmatmul.msk.f32.gmra.mxu3 %vm136_vm0, %v1175_v19  ;;  %848 = vmatmul.msk.f32.gmra.mxu0 %vm136_vm0, %v1177_v20 }
  0x27   :  { %254 = vmatpush.msra.mxu2 %v125_v24  ;;  %348 = vmatpush.msrb.mxu0 %v319_v25 }
  0x28   :  { %213 = vmatpush.msra.mxu1 %v179_v26  ;;  %411 = vmatpush.msrb.mxu3 %v1219_v47 }
  0x29   :  { %255 = vmatpush.msra.mxu2 %v124_v27  ;;  %349 = vmatpush.msrb.mxu0 %v318_v28 }
  0x2a   :  { %855 = vmatmul.msk.f32.vlgmr.msra.gmra.mxu2 %vm186_vm1, %v1161_v3  ;;  %214 = vmatpush.msra.mxu1 %v178_v33 }
  0x2b   :  { %350 = vmatpush.msrb.mxu0 %v317_v34  ;;  %412 = vmatpush.msrb.mxu3 %v1223_v49 }
  0x2c   :  { %433 = vmatpush.msrb.mxu1 %v1215_v46 }
  0x2d   :  { %351 = vmatpush.msrb.mxu0 %v316_v35  ;;  %413 = vmatpush.msrb.mxu3 %v1227_v51 }
  0x2e   :  { %861 = vmatmul.msk.f32.gmra.mxu3 %vm136_vm0, %v1183_v29  ;;  %849 = vmatmul.msk.f32.gmra.mxu0 %vm136_vm0, %v1185_v30 }
  0x2f   :  { %434 = vmatpush.msrb.mxu1 %v1219_v47  ;;  %414 = vmatpush.msrb.mxu3 %v1231_v53 }
  0x31   :  { %435 = vmatpush.msrb.mxu1 %v1223_v49  ;;  %415 = vmatpush.msrb.mxu3 %v1233_v54 }
  0x32   :  { %856 = vmatmul.msk.f32.gmra.mxu2 %vm186_vm1, %v1157_v2 }
  0x33   :  { %436 = vmatpush.msrb.mxu1 %v1227_v51  ;;  %416 = vmatpush.msrb.mxu3 %v1237_v55 }
  0x35   :  { %437 = vmatpush.msrb.mxu1 %v1231_v53  ;;  %417 = vmatpush.msrb.mxu3 %v1241_v56 }
  0x36   :  { %862 = vmatmul.msk.f32.gmra.mxu3 %vm136_vm0, %v1193_v31  ;;  %850 = vmatmul.msk.f32.gmra.mxu0 %vm136_vm0, %v1195_v32 }
  0x37   :  { %438 = vmatpush.msrb.mxu1 %v1233_v54 }
  0x39   :  { %439 = vmatpush.msrb.mxu1 %v1237_v55 }
  0x3a   :  { %857 = vmatmul.msk.f32.gmra.mxu2 %vm186_vm1, %v1153_v1 }
  0x3b   :  { %440 = vmatpush.msrb.mxu1 %v1241_v56 }
  0x42   :  { %858 = vmatmul.msk.f32.gmra.mxu2 %vm186_vm1, %v1151_v0 }
  0x9b   :  { %v166_v36 = vpop.f32.mrf.mxu0 }
  0x9c   :  { %851 = vmatmul.msk.f32.vlgmr.msra.gmra.mxu1 %vm186_vm1, %v166_v36 }
  0xa1   :  { %v303_v37 = vpop.f32.mrf.mxu3 }
  0xa2   :  { %863 = vmatmul.msk.f32.vlgmr.msrb.gmra.mxu0 %vm186_vm1, %v303_v37 }
  0xa3   :  { %v169_v38 = vpop.f32.mrf.mxu0 }
  0xa4   :  { %852 = vmatmul.msk.f32.gmra.mxu1 %vm186_vm1, %v169_v38 }
  0xa9   :  { %v306_v39 = vpop.f32.mrf.mxu3 }
  0xaa   :  { %864 = vmatmul.msk.f32.gmra.mxu0 %vm186_vm1, %v306_v39 }
  0xab   :  { %v172_v40 = vpop.f32.mrf.mxu0 }
  0xac   :  { %853 = vmatmul.msk.f32.gmra.mxu1 %vm186_vm1, %v172_v40 }
  0xad   :  { %v257_v44 = vpop.f32.mrf.mxu2 }
  0xb1   :  { %v309_v41 = vpop.f32.mrf.mxu3 }
  0xb2   :  { %865 = vmatmul.msk.f32.gmra.mxu0 %vm186_vm1, %v309_v41 }
  0xb3   :  { %v175_v42 = vpop.f32.mrf.mxu0 }
  0xb4   :  { %854 = vmatmul.msk.f32.gmra.mxu1 %vm186_vm1, %v175_v42 }
  0xb5   :  { %v260_v48 = vpop.f32.mrf.mxu2 }
  0xb9   :  { %v312_v43 = vpop.f32.mrf.mxu3 }
  0xba   :  { %866 = vmatmul.msk.f32.gmra.mxu0 %vm186_vm1, %v312_v43 }
  0xbd   :  { %v263_v58 = vpop.f32.mrf.mxu2 }
  0xc5   :  { %v266_v10 = vpop.f32.mrf.mxu2 }
 0x119   :  { %v216_v45 = vpop.f32.mrf.mxu1 }
 0x11a   :  { %v258_v61 = vadd.f32 %v257_v44, %v216_v45 }
 0x11f   :  { %v353_v50 = vpop.f32.mrf.mxu0 }
 0x120   :  { %v1249_v7 = vadd.f32 %v353_v50, %v258_v61  ;;  %v493_v61 = vld [vmem:[#allocation8 + $0x60] sm:$0xff] }
 0x121   :  { %v219_v52 = vpop.f32.mrf.mxu1 }
 0x122   :  { %v261_v60 = vadd.f32 %v260_v48, %v219_v52  ;;  %v382_v12 = vmul.f32 %v1249_v7, %v1249_v7  ;;  %v369_v16 = vsel %vm186_vm1, %v1249_v7, 0.0 }
 0x124   :  { %v386_v23 = vsel %vm186_vm1, %v382_v12, 0.0 }
 0x127   :  { %v356_v57 = vpop.f32.mrf.mxu0 }
 0x128   :  { %v1247_v63 = vadd.f32 %v356_v57, %v261_v60  ;;  %v494_v60 = vld [vmem:[#allocation8 + $0x68] sm:$0xff] }
 0x129   :  { %v222_v59 = vpop.f32.mrf.mxu1 }
 0x12a   :  { %v264_v62 = vadd.f32 %v263_v58, %v222_v59  ;;  %v383_v11 = vmul.f32 %v1247_v63, %v1247_v63  ;;  %v370_v13 = vsel %vm186_vm1, %v1247_v63, 0.0  ;;  %v496_v58 = vld [vmem:[#allocation8 + $0x78] sm:$0xff]  ;;  %v495_v59 = vld [vmem:[#allocation8 + $0x70] sm:$0xff] }
 0x12b   :  { %v371_v21 = vadd.f32 %v370_v13, %v369_v16  ;;  %595 = vmatpush.msra.mxu1 %v496_v58  ;;  %v533_v58 = vld [vmem:[#allocation8 + $0x38] sm:$0xff] }
 0x12c   :  { %v387_v17 = vsel %vm186_vm1, %v383_v11, 0.0  ;;  %v489_v11 = vld [vmem:[#allocation8 + $0x40] sm:$0xff] }
 0x12d   :  { %v388_v26 = vadd.f32 %v387_v17, %v386_v23  ;;  %596 = vmatpush.msra.mxu1 %v495_v59  ;;  %v651_v59 = vld [vmem:[#allocation8 + $0xa8] sm:$0xff] }
 0x12f   :  { %v359_v4 = vpop.f32.mrf.mxu0  ;;  %597 = vmatpush.msra.mxu1 %v494_v60  ;;  %v650_v60 = vld [vmem:[#allocation8 + $0xa0] sm:$0xff] }
 0x130   :  { %v1251_v8 = vadd.f32 %v359_v4, %v264_v62  ;;  %v492_v62 = vld [vmem:[#allocation8 + $0x58] sm:$0xff]  ;;  %v491_v4 = vld [vmem:[#allocation8 + $0x50] sm:$0xff] }
 0x131   :  { %v225_v9 = vpop.f32.mrf.mxu1  ;;  %598 = vmatpush.msra.mxu1 %v493_v61  ;;  %v649_v61 = vld [vmem:[#allocation8 + $0x98] sm:$0xff] }
 0x132   :  { %v384_v14 = vmul.f32 %v1251_v8, %v1251_v8  ;;  %v267_v15 = vadd.f32 %v266_v10, %v225_v9  ;;  %v372_v18 = vsel %vm186_vm1, %v1251_v8, 0.0  ;;  %v490_v9 = vld [vmem:[#allocation8 + $0x48] sm:$0xff] }
 0x133   :  { %v373_v27 = vadd.f32 %v372_v18, %v371_v21  ;;  %599 = vmatpush.msra.mxu1 %v492_v62  ;;  %v527_v62 = vld [vmem:[#allocation8 + $0x8] sm:$0xff] }
 0x134   :  { %v389_v24 = vsel %vm186_vm1, %v384_v14, 0.0 }
 0x135   :  { %v390_v34 = vadd.f32 %v389_v24, %v388_v26  ;;  %600 = vmatpush.msra.mxu1 %v491_v4  ;;  %v526_v4 = vld [vmem:[#allocation8] sm:$0xff] }
 0x137   :  { %v362_v22 = vpop.f32.mrf.mxu0  ;;  %601 = vmatpush.msra.mxu1 %v490_v9  ;;  %v647_v9 = vld [vmem:[#allocation8 + $0x88] sm:$0xff] }
 0x138   :  { %v1268_v25 = vadd.f32 %v362_v22, %v267_v15 }
 0x139   :  { %602 = vmatpush.msra.mxu1 %v489_v11 }
 0x13a   :  { %v374_v28 = vsel %vm186_vm1, %v1268_v25, 0.0  ;;  %v385_v33 = vmul.f32 %v1268_v25, %v1268_v25 }
 0x13b   :  { %v375_v35 = vadd.f32 %v374_v28, %v373_v27 }
 0x13c   :  { %v391_v36 = vsel %vm186_vm1, %v385_v33, 0.0 }
 0x13d   :  { %v376_v37 = vrot.slane %v375_v35, 4  ;;  %v392_v38 = vadd.f32 %v391_v36, %v390_v34  ;;  %v903_v36 = vld [vmem:[%s1384_s5] ss:$0 sm:$0xff] }
 0x13f   :  { %v377_v39 = vadd.f32 %v376_v37, %v375_v35  ;;  %v393_v40 = vrot.slane %v392_v38, 4 }
 0x141   :  { %v378_v41 = vrot.slane %v377_v39, 2  ;;  %v394_v42 = vadd.f32 %v393_v40, %v392_v38 }
 0x143   :  { %v379_v43 = vadd.f32 %v378_v41, %v377_v39  ;;  %v395_v44 = vrot.slane %v394_v42, 2 }
 0x145   :  { %v380_v45 = vrot.slane %v379_v43, 1  ;;  %v396_v48 = vadd.f32 %v395_v44, %v394_v42 }
 0x147   :  { %v381_v50 = vadd.f32 %v380_v45, %v379_v43  ;;  %v397_v52 = vrot.slane %v396_v48, 1 }
 0x149   :  { %867 = vmatmul.msk.f32.vlgmr.msrb.gmra.mxu3 %vm186_vm1, %v381_v50  ;;  %v398_v57 = vadd.f32 %v397_v52, %v396_v48 }
 0x14b   :  { %868 = vmatmul.msk.f32.vlgmr.msrb.gmra.mxu1 %vm186_vm1, %v398_v57 }
 0x14c   :  { %763 = vmatpush.msrb.mxu1 %v1215_v46 }
 0x14e   :  { %764 = vmatpush.msrb.mxu1 %v1219_v47 }
 0x150   :  { %765 = vmatpush.msrb.mxu1 %v1223_v49 }
 0x152   :  { %766 = vmatpush.msrb.mxu1 %v1227_v51 }
 0x154   :  { %767 = vmatpush.msrb.mxu1 %v1231_v53 }
 0x156   :  { %768 = vmatpush.msrb.mxu1 %v1233_v54 }
 0x158   :  { %769 = vmatpush.msrb.mxu1 %v1237_v55 }
 0x15a   :  { %770 = vmatpush.msrb.mxu1 %v1241_v56 }
 0x1c8   :  { %v442_v13 = vpop.f32.mrf.mxu1 }
 0x1cc   :  { %v419_v10 = vpop.f32.mrf.mxu3 }
 0x1cd   :  { %v445_v12 = vmul.f32 %v419_v10, %v419_v10  ;;  %v447_v22 = vperm.slane %v419_v10, 0  ;;  %v646_v10 = vld [vmem:[#allocation8 + $0x80] sm:$0xff] }
 0x1cf   :  { %v446_v14 = vsub.f32 %v442_v13, %v445_v12  ;;  %v448_v26 = vsub.f32 %v1249_v7, %v447_v22  ;;  %v449_v28 = vsub.f32 %v1247_v63, %v447_v22  ;;  %v450_v33 = vsub.f32 %v1251_v8, %v447_v22  ;;  %v904_v7 = vld [vmem:[%s1385_s6] ss:$0 sm:$0xff] }
 0x1d0   :  { %v451_v34 = vsub.f32 %v1268_v25, %v447_v22 }
 0x1d1   :  { %v452_v15 = vadd.f32 1e-05, %v446_v14 }
 0x1d3   :  { %907 = vrsqrt.f32 %v452_v15  ;;  %vm459_vm3 = vweird.f32 %v452_v15 }
 0x1d9   :  { %v908_v16 = vpop.eup %907 }
 0x1da   :  { %v454_v17 = vmul.f32 %v908_v16, %v452_v15  ;;  %vm460_vm2 = vweird.f32 %v908_v16 }
 0x1db   :  { %vm461_vm4 = vmor %vm459_vm3, %vm460_vm2 }
 0x1dc   :  { %v455_v18 = vmul.f32 %v908_v16, %v454_v17 }
 0x1de   :  { %v456_v21 = vmul.f32 0.5, %v455_v18 }
 0x1e0   :  { %v457_v23 = vsub.f32 1.5, %v456_v21 }
 0x1e2   :  { %v458_v24 = vmul.f32 %v908_v16, %v457_v23 }
 0x1e4   :  { %v462_v27 = vsel %vm461_vm4, %v908_v16, %v458_v24 }
 0x1e5   :  { %v463_v35 = vperm.slane %v462_v27, 0 }
 0x1e7   :  { %v464_v37 = vmul.f32 %v463_v35, %v448_v26  ;;  %v465_v38 = vmul.f32 %v463_v35, %v449_v28  ;;  %v466_v39 = vmul.f32 %v463_v35, %v450_v33  ;;  %v467_v40 = vmul.f32 %v463_v35, %v451_v34 }
 0x1e9   :  { %v472_v41 = vmul.f32 %v903_v36, %v464_v37  ;;  %v475_v42 = vmul.f32 %v903_v36, %v467_v40  ;;  %v474_v63 = vmul.f32 %v903_v36, %v466_v39  ;;  %v473_v43 = vmul.f32 %v903_v36, %v465_v38 }
 0x1eb   :  { %v483_v8 = vadd.f32 %v904_v7, %v475_v42  ;;  %v480_v44 = vadd.f32 %v904_v7, %v472_v41  ;;  %v482_v25 = vadd.f32 %v904_v7, %v474_v63  ;;  %v481_v50 = vadd.f32 %v904_v7, %v473_v43 }
 0x1ed   :  { %v487_v45 = vmax.f32 %v483_v8, 0.0  ;;  %v484_v48 = vmax.f32 %v480_v44, 0.0  ;;  %v486_v52 = vmax.f32 %v482_v25, 0.0  ;;  %v485_v57 = vmax.f32 %v481_v50, 0.0 }
 0x1ef   :  { %509 = vmatpush.msrb.mxu2 %v487_v45  ;;  %891 = vmatpush.msra.mxu3 %v487_v45 }
 0x1f0   :  { %877 = vmatmul.msk.f32.vlgmr.msra.gmra.mxu1 %vm186_vm1, %v484_v48  ;;  %628 = vmatpush.msra.mxu0 %v487_v45 }
 0x1f1   :  { %510 = vmatpush.msrb.mxu2 %v486_v52  ;;  %892 = vmatpush.msra.mxu3 %v486_v52 }
 0x1f2   :  { %629 = vmatpush.msra.mxu0 %v486_v52 }
 0x1f3   :  { %511 = vmatpush.msrb.mxu2 %v485_v57  ;;  %893 = vmatpush.msra.mxu3 %v485_v57 }
 0x1f4   :  { %630 = vmatpush.msra.mxu0 %v485_v57 }
 0x1f5   :  { %512 = vmatpush.msrb.mxu2 %v484_v48  ;;  %894 = vmatpush.msra.mxu3 %v484_v48 }
 0x1f6   :  { %631 = vmatpush.msra.mxu0 %v484_v48  ;;  %869 = vmatmul.msk.f32.vlgmr.msrb.gmra.mxu2 %vm136_vm0, %v1167_v6  ;;  %v653_v6 = vld [vmem:[#allocation8 + $0xb8] sm:$0xff] }
 0x1f7   :  { %881 = vmatmul.msk.f32.vlgmr.msra.gmra.mxu0 %vm136_vm0, %v1164_v5  ;;  %871 = vmatmul.msk.f32.vlgmr.msra.gmra.mxu3 %vm136_vm0, %v1185_v30  ;;  %v532_v5 = vld [vmem:[#allocation8 + $0x30] sm:$0xff]  ;;  %v531_v30 = vld [vmem:[#allocation8 + $0x28] sm:$0xff] }
 0x1f8   :  { %878 = vmatmul.msk.f32.gmra.mxu1 %vm186_vm1, %v485_v57  ;;  %554 = vmatpush.msrb.mxu3 %v533_v58 }
 0x1f9   :  { %674 = vmatpush.msra.mxu2 %v653_v6 }
 0x1fa   :  { %555 = vmatpush.msrb.mxu3 %v532_v5 }
 0x1fc   :  { %556 = vmatpush.msrb.mxu3 %v531_v30 }
 0x1fe   :  { %870 = vmatmul.msk.f32.gmra.mxu2 %vm136_vm0, %v1177_v20  ;;  %v652_v20 = vld [vmem:[#allocation8 + $0xb0] sm:$0xff] }
 0x1ff   :  { %882 = vmatmul.msk.f32.gmra.mxu0 %vm136_vm0, %v1175_v19  ;;  %872 = vmatmul.msk.f32.gmra.mxu3 %vm136_vm0, %v1195_v32  ;;  %v530_v19 = vld [vmem:[#allocation8 + $0x20] sm:$0xff]  ;;  %v529_v32 = vld [vmem:[#allocation8 + $0x18] sm:$0xff] }
 0x200   :  { %879 = vmatmul.msk.f32.gmra.mxu1 %vm186_vm1, %v486_v52  ;;  %675 = vmatpush.msra.mxu2 %v652_v20 }
 0x201   :  { %557 = vmatpush.msrb.mxu3 %v530_v19 }
 0x202   :  { %676 = vmatpush.msra.mxu2 %v651_v59 }
 0x203   :  { %558 = vmatpush.msrb.mxu3 %v529_v32 }
 0x204   :  { %677 = vmatpush.msra.mxu2 %v650_v60 }
 0x206   :  { %678 = vmatpush.msra.mxu2 %v649_v61 }
 0x207   :  { %883 = vmatmul.msk.f32.gmra.mxu0 %vm136_vm0, %v1183_v29  ;;  %v528_v29 = vld [vmem:[#allocation8 + $0x10] sm:$0xff] }
 0x208   :  { %880 = vmatmul.msk.f32.gmra.mxu1 %vm186_vm1, %v487_v45  ;;  %559 = vmatpush.msrb.mxu3 %v528_v29 }
 0x20a   :  { %560 = vmatpush.msrb.mxu3 %v527_v62 }
 0x20c   :  { %561 = vmatpush.msrb.mxu3 %v526_v4 }
 0x20e   :  { %740 = vmatpush.msra.mxu3 %v1215_v46 }
 0x20f   :  { %884 = vmatmul.msk.f32.gmra.mxu0 %vm136_vm0, %v1193_v31  ;;  %v648_v31 = vld [vmem:[#allocation8 + $0x90] sm:$0xff] }
 0x210   :  { %679 = vmatpush.msra.mxu2 %v648_v31  ;;  %741 = vmatpush.msra.mxu3 %v1219_v47 }
 0x212   :  { %680 = vmatpush.msra.mxu2 %v647_v9  ;;  %742 = vmatpush.msra.mxu3 %v1223_v49 }
 0x214   :  { %681 = vmatpush.msra.mxu2 %v646_v10  ;;  %743 = vmatpush.msra.mxu3 %v1227_v51 }
 0x216   :  { %744 = vmatpush.msra.mxu3 %v1231_v53 }
 0x218   :  { %745 = vmatpush.msra.mxu3 %v1233_v54 }
 0x21a   :  { %746 = vmatpush.msra.mxu3 %v1237_v55 }
 0x21c   :  { %747 = vmatpush.msra.mxu3 %v1241_v56 }
 0x26d   :  { %v604_v55 = vpop.f32.mrf.mxu1 }
 0x274   :  { %v633_v11 = vpop.f32.mrf.mxu0 }
 0x275   :  { %885 = vmatmul.msk.f32.vlgmr.msra.gmra.mxu2 %vm186_vm1, %v633_v11  ;;  %v607_v14 = vpop.f32.mrf.mxu1 }
 0x279   :  { %v514_v12 = vpop.f32.mrf.mxu2 }
 0x27a   :  { %873 = vmatmul.msk.f32.vlgmr.msrb.gmra.mxu3 %vm186_vm1, %v514_v12  ;;  %v520_v51 = vpop.f32.mrf.mxu3 }
 0x27c   :  { %v636_v46 = vpop.f32.mrf.mxu0 }
 0x27d   :  { %886 = vmatmul.msk.f32.gmra.mxu2 %vm186_vm1, %v636_v46  ;;  %v610_v17 = vpop.f32.mrf.mxu1 }
 0x281   :  { %v517_v47 = vpop.f32.mrf.mxu2 }
 0x282   :  { %874 = vmatmul.msk.f32.gmra.mxu3 %vm186_vm1, %v517_v47  ;;  %v523_v54 = vpop.f32.mrf.mxu3 }
 0x284   :  { %v639_v49 = vpop.f32.mrf.mxu0 }
 0x285   :  { %887 = vmatmul.msk.f32.gmra.mxu2 %vm186_vm1, %v639_v49  ;;  %v613_v34 = vpop.f32.mrf.mxu1 }
 0x28a   :  { %875 = vmatmul.msk.f32.gmra.mxu3 %vm186_vm1, %v520_v51 }
 0x28c   :  { %v642_v53 = vpop.f32.mrf.mxu0 }
 0x28d   :  { %888 = vmatmul.msk.f32.gmra.mxu2 %vm186_vm1, %v642_v53 }
 0x292   :  { %876 = vmatmul.msk.f32.gmra.mxu3 %vm186_vm1, %v523_v54 }
 0x2f8   :  { %v683_v56 = vpop.f32.mrf.mxu2 }
 0x2fd   :  { %v563_v13 = vpop.f32.mrf.mxu3 }
 0x2fe   :  { %v605_v22 = vadd.f32 %v604_v55, %v563_v13 }
 0x300   :  { %v686_v15 = vpop.f32.mrf.mxu2  ;;  %v1333_v27 = vadd.f32 %v683_v56, %v605_v22 }
 0x302   :  { %v712_v35 = vmul.f32 %v1333_v27, %v1333_v27  ;;  %v699_v40 = vsel %vm186_vm1, %v1333_v27, 0.0 }
 0x304   :  { %v716_v43 = vsel %vm186_vm1, %v712_v35, 0.0 }
 0x305   :  { %v566_v16 = vpop.f32.mrf.mxu3 }
 0x306   :  { %v608_v18 = vadd.f32 %v607_v14, %v566_v16 }
 0x308   :  { %v689_v21 = vpop.f32.mrf.mxu2  ;;  %v1331_v24 = vadd.f32 %v686_v15, %v608_v18 }
 0x30a   :  { %v713_v33 = vmul.f32 %v1331_v24, %v1331_v24  ;;  %v700_v36 = vsel %vm186_vm1, %v1331_v24, 0.0 }
 0x30b   :  { %v701_v63 = vadd.f32 %v700_v36, %v699_v40 }
 0x30c   :  { %v717_v7 = vsel %vm186_vm1, %v713_v33, 0.0 }
 0x30d   :  { %v569_v23 = vpop.f32.mrf.mxu3  ;;  %v718_v25 = vadd.f32 %v717_v7, %v716_v43 }
 0x30e   :  { %v611_v26 = vadd.f32 %v610_v17, %v569_v23 }
 0x310   :  { %v1335_v28 = vadd.f32 %v689_v21, %v611_v26  ;;  %v692_v39 = vpop.f32.mrf.mxu2  ;;  %v905_v21 = vld [vmem:[%s1386_s7] ss:$0 sm:$0xff]  ;;  %s1070_s7 = smov [#allocation11]  }
 0x312   :  { %v714_v37 = vmul.f32 %v1335_v28, %v1335_v28  ;;  %v702_v41 = vsel %vm186_vm1, %v1335_v28, 0.0 }
 0x313   :  { %v703_v45 = vadd.f32 %v702_v41, %v701_v63 }
 0x314   :  { %v719_v8 = vsel %vm186_vm1, %v714_v37, 0.0 }
 0x315   :  { %v572_v38 = vpop.f32.mrf.mxu3  ;;  %v720_v52 = vadd.f32 %v719_v8, %v718_v25 }
 0x316   :  { %v614_v42 = vadd.f32 %v613_v34, %v572_v38  ;;  %v906_v34 = vld [vmem:[%s1387_s8] ss:$0 sm:$0xff]  ;;  %s830_s8 = sshll.u32 %s1070_s7, 4  ;;  %s831_s8 = int_to_ptr.vmem [resolvable:$true] %s830_s8 }
 0x318   :  { %v698_v44 = vadd.f32 %v692_v39, %v614_v42 }
 0x31a   :  { %v704_v48 = vsel %vm186_vm1, %v698_v44, 0.0  ;;  %v715_v50 = vmul.f32 %v698_v44, %v698_v44 }
 0x31b   :  { %v705_v57 = vadd.f32 %v704_v48, %v703_v45 }
 0x31c   :  { %v721_v58 = vsel %vm186_vm1, %v715_v50, 0.0 }
 0x31d   :  { %v706_v5 = vrot.slane %v705_v57, 4  ;;  %v722_v6 = vadd.f32 %v721_v58, %v720_v52 }
 0x31f   :  { %v707_v30 = vadd.f32 %v706_v5, %v705_v57  ;;  %v723_v20 = vrot.slane %v722_v6, 4 }
 0x321   :  { %v708_v19 = vrot.slane %v707_v30, 2  ;;  %v724_v59 = vadd.f32 %v723_v20, %v722_v6 }
 0x323   :  { %v709_v32 = vadd.f32 %v708_v19, %v707_v30  ;;  %v725_v60 = vrot.slane %v724_v59, 2 }
 0x325   :  { %v710_v29 = vrot.slane %v709_v32, 1  ;;  %v726_v61 = vadd.f32 %v725_v60, %v724_v59 }
 0x327   :  { %v711_v62 = vadd.f32 %v710_v29, %v709_v32  ;;  %v727_v31 = vrot.slane %v726_v61, 1 }
 0x329   :  { %889 = vmatmul.msk.f32.vlgmr.msra.gmra.mxu3 %vm186_vm1, %v711_v62  ;;  %v728_v4 = vadd.f32 %v727_v31, %v726_v61 }
 0x32b   :  { %890 = vmatmul.msk.f32.vlgmr.msrb.gmra.mxu1 %vm186_vm1, %v728_v4 }
 0x3a8   :  { %v772_v11 = vpop.f32.mrf.mxu1 }
 0x3ac   :  { %v749_v9 = vpop.f32.mrf.mxu3 }
 0x3ad   :  { %v775_v10 = vmul.f32 %v749_v9, %v749_v9  ;;  %v777_v54 = vperm.slane %v749_v9, 0 }
 0x3af   :  { %v776_v12 = vsub.f32 %v772_v11, %v775_v10  ;;  %v778_v13 = vsub.f32 %v1333_v27, %v777_v54  ;;  %v779_v15 = vsub.f32 %v1331_v24, %v777_v54  ;;  %v780_v16 = vsub.f32 %v1335_v28, %v777_v54 }
 0x3b0   :  { %v781_v17 = vsub.f32 %v698_v44, %v777_v54 }
 0x3b1   :  { %v782_v46 = vadd.f32 1e-05, %v776_v12 }
 0x3b3   :  { %909 = vrsqrt.f32 %v782_v46  ;;  %vm789_vm6 = vweird.f32 %v782_v46 }
 0x3b9   :  { %v910_v47 = vpop.eup %909 }
 0x3ba   :  { %v784_v49 = vmul.f32 %v910_v47, %v782_v46  ;;  %vm790_vm5 = vweird.f32 %v910_v47 }
 0x3bb   :  { %vm791_vm7 = vmor %vm789_vm6, %vm790_vm5 }
 0x3bc   :  { %v785_v51 = vmul.f32 %v910_v47, %v784_v49 }
 0x3be   :  { %v786_v53 = vmul.f32 0.5, %v785_v51 }
 0x3c0   :  { %v787_v55 = vsub.f32 1.5, %v786_v53 }
 0x3c2   :  { %v788_v56 = vmul.f32 %v910_v47, %v787_v55 }
 0x3c4   :  { %v792_v14 = vsel %vm791_vm7, %v910_v47, %v788_v56 }
 0x3c5   :  { %v793_v18 = vperm.slane %v792_v14, 0 }
 0x3c7   :  { %v794_v22 = vmul.f32 %v793_v18, %v778_v13  ;;  %v795_v23 = vmul.f32 %v793_v18, %v779_v15  ;;  %v796_v26 = vmul.f32 %v793_v18, %v780_v16  ;;  %v797_v33 = vmul.f32 %v793_v18, %v781_v17 }
 0x3c9   :  { %v802_v27 = vmul.f32 %v905_v21, %v794_v22  ;;  %v803_v35 = vmul.f32 %v905_v21, %v795_v23  ;;  %v804_v36 = vmul.f32 %v905_v21, %v796_v26  ;;  %v805_v24 = vmul.f32 %v905_v21, %v797_v33 }
 0x3cb   :  { %v810_v37 = vadd.f32 %v906_v34, %v802_v27  ;;  %v811_v28 = vadd.f32 %v906_v34, %v803_v35  ;;  %v812_v38 = vadd.f32 %v906_v34, %v804_v36  ;;  %v813_v39 = vadd.f32 %v906_v34, %v805_v24 }
 0x3cd   :  { %v814_v40 = vadd.f32 %v810_v37, %v1161_v3  ;;  %v815_v7 = vadd.f32 %v811_v28, %v1157_v2  ;;  %v816_v41 = vadd.f32 %v812_v38, %v1153_v1  ;;  %v817_v42 = vadd.f32 %v813_v39, %v1151_v0 }
 0x3cf   :  { %v818_v63 = vmax.f32 %v814_v40, 0.0  ;;  %v819_v43 = vmax.f32 %v815_v7, 0.0  ;;  %v820_v8 = vmax.f32 %v816_v41, 0.0  ;;  %v821_v44 = vmax.f32 %v817_v42, 0.0 }
 0x3d1   :  { %822 = vst.msk [vmem:[#allocation11] sm:$0xff] %vm186_vm1, %v818_v63 }
 0x3d2   :  { %823 = vst.msk [vmem:[#allocation11 + $0x8] sm:$0xff] %vm186_vm1, %v819_v43 }
 0x3d3   :  { %824 = vst.msk [vmem:[#allocation11 + $0x10] sm:$0xff] %vm186_vm1, %v820_v8 }
 0x3d4   :  { %825 = vst.msk [vmem:[#allocation11 + $0x18] sm:$0xff] %vm186_vm1, %v821_v44 }
 0x3d5   :  { %838 = dma.vmem_to_hbm [thread:$0]  %s831_s8, 512, %s833_s20, [#allocation4], %s1064_s17, %s1064_s17, %s1065_s18  }
 0x3d6   :  { %1061 = dma.done.wait [#allocation4], 512  }
 0x3d7   :  { %1062 = vsyncadd [#allocation4], 4294966784 }
 0x3d8   :  { %843 = vsyncpa [#allocation3], 1 }
 0x3d9   :  { %844 = vsyncpa [#allocation6], 1 }
 0x3da   :  { %845 = vsyncpa [#allocation9], 1 }
 0x3db   :  { %846 = vsyncpa [#allocation4], 1 }

</bundles_post_ra>
